<compile_context>
chip_gen: v5e
topology: v5e:2x2
jax: 0.10.0
libtpu: 0.0.40
codegen_flags: <defaults>
</compile_context>

<pallas_src>
import functools

import jax
import jax.numpy as jnp
from jax.experimental import pallas as pl
from jax.experimental.pallas import tpu as pltpu


def _make_rnn_stack_kernel(num_layers, T, B, H):
    """Build a fused kernel for an `num_layers`-deep tanh RNN stack.

    Kernel refs (in order):
      x2d_ref   : (T*B, D)  f32   layer-0 input, time-major, row block t = timestep t
      lens_ref  : (B, 1)    int32 seq_length - 1 (index of last valid step)
      per layer l: wih_l (Din_l, H), whh_l (H, H), bias_l (1, H)   [W^T layout]
      out_ref   : (B, H)    f32   final-layer hidden state at t = seq_length-1
      seq_scr   : (T*B, H)  f32   VMEM scratch holding the current layer's output sequence
    """

    def kernel(x2d_ref, lens_ref, *rest):
        w_refs = rest[: 3 * num_layers]
        out_ref = rest[3 * num_layers]
        seq_scr = rest[3 * num_layers + 1]

        lens = lens_ref[...]                      # (B, 1) int32, loaded once
        last = jnp.zeros((B, H), jnp.float32)

        layer_in = x2d_ref[...]                   # (T*B, Din) value, loaded once
        for layer in range(num_layers):
            wih = w_refs[3 * layer][...]          # (Din, H)  hoisted out of time loop
            whh = w_refs[3 * layer + 1][...]      # (H, H)
            bias = w_refs[3 * layer + 2][...]     # (1, H)

            # Hoisted input projection: one big MXU matmul for all T timesteps,
            # off the serial recurrence path.
            xw = jnp.dot(layer_in, wih, preferred_element_type=jnp.float32) + bias

            h = jnp.zeros((B, H), jnp.float32)
            is_final = layer == num_layers - 1
            # Fully unrolled time recurrence (static T); only h @ W_hh^T + tanh
            # remain on the serial chain.
            for t in range(T):
                xw_t = xw[t * B:(t + 1) * B, :]   # static slice, rows of timestep t
                h = jnp.tanh(
                    xw_t + jnp.dot(h, whh, preferred_element_type=jnp.float32))
                if is_final:
                    # select hidden state at each sequence's last valid timestep
                    last = jnp.where(lens == t, h, last)
                else:
                    seq_scr[pl.ds(t * B, B), :] = h

            if not is_final:
                layer_in = seq_scr[...]           # next layer's input, bulk load

        out_ref[...] = last

    return kernel


@functools.partial(jax.jit, static_argnames=("hidden_size",))
def rnn_layers_forward(seq, seq_length, params, hidden_size):
    """Equivalent of RNN_layers.forward.

    seq        : (B, T, D) float32, batch-first (PyTorch convention)
    seq_length : (B,) int32, valid lengths (1 <= len <= T)
    params     : list of (w_ih (H,Din), w_hh (H,H), b_ih (H,), b_hh (H,)) per layer
    returns    : (B, 1, hidden_size) float32
    """
    B, T, D = seq.shape
    H = hidden_size
    L = len(params)

    # time-major, flattened so timestep t occupies rows [t*B, (t+1)*B)
    x2d = jnp.transpose(seq, (1, 0, 2)).astype(jnp.float32).reshape(T * B, D)
    lens_m1 = (seq_length.astype(jnp.int32) - 1).reshape(B, 1)

    weight_args = []
    for (w_ih, w_hh, b_ih, b_hh) in params:
        weight_args += [
            jnp.transpose(w_ih).astype(jnp.float32),          # (Din, H)
            jnp.transpose(w_hh).astype(jnp.float32),          # (H, H)
            (b_ih + b_hh).astype(jnp.float32).reshape(1, H),  # (1, H)
        ]

    vmem = pl.BlockSpec(memory_space=pltpu.MemorySpace.VMEM)
    # TODO(synk): for production-sized T/B add a time-chunked grid ("arbitrary" axis,
    # h carried in scratch) + batch "parallel" axis instead of full VMEM residency.
    last = pl.pallas_call(
        _make_rnn_stack_kernel(L, T, B, H),
        out_shape=jax.ShapeDtypeStruct((B, H), jnp.float32),
        in_specs=[vmem] * (2 + 3 * L),
        out_specs=vmem,
        scratch_shapes=[pltpu.VMEM((T * B, H), jnp.float32)],
    )(x2d, lens_m1, *weight_args)

    return last.reshape(B, 1, H)


def _reference_forward(seq, seq_length, params):
    """Plain-JAX reference (same math as torch nn.RNN + gather at len-1)."""
    B, T, D = seq.shape
    x = seq.astype(jnp.float32)
    for (w_ih, w_hh, b_ih, b_hh) in params:
        H = w_hh.shape[0]

        def step(h, x_t, w_ih=w_ih, w_hh=w_hh, b_ih=b_ih, b_hh=b_hh):
            h_new = jnp.tanh(x_t @ w_ih.T + b_ih + h @ w_hh.T + b_hh)
            return h_new, h_new

        h0 = jnp.zeros((B, H), jnp.float32)
        _, ys = jax.lax.scan(step, h0, jnp.transpose(x, (1, 0, 2)))
        x = jnp.transpose(ys, (1, 0, 2))
    idx = seq_length.astype(jnp.int32) - 1
    return x[jnp.arange(B), idx][:, None, :]


def init_rnn_params(key, input_size, hidden_size, num_layers):
    """Deterministic init, same shapes / U(-1/sqrt(H), 1/sqrt(H)) as torch.nn.RNN."""
    params = []
    k = 1.0 / jnp.sqrt(jnp.float32(hidden_size))
    for layer in range(num_layers):
        din = input_size if layer == 0 else hidden_size
        key, k1, k2, k3, k4 = jax.random.split(key, 5)
        w_ih = jax.random.uniform(k1, (hidden_size, din), jnp.float32, -k, k)
        w_hh = jax.random.uniform(k2, (hidden_size, hidden_size), jnp.float32, -k, k)
        b_ih = jax.random.uniform(k3, (hidden_size,), jnp.float32, -k, k)
        b_hh = jax.random.uniform(k4, (hidden_size,), jnp.float32, -k, k)
        params.append((w_ih, w_hh, b_ih, b_hh))
    return params


if __name__ == "__main__":
    # args.hidden_size = 32, args.rnn_layers = 2, inputs_hidden = 16
    B, T, D, H, L = 4, 8, 16, 32, 2

    key = jax.random.PRNGKey(0)
    key, k_seq = jax.random.split(key)
    seq = jax.random.normal(k_seq, (B, T, D), jnp.float32)
    seq_length = jnp.array([5, 8, 3, 7], dtype=jnp.int32)   # valid lengths <= T

    params = init_rnn_params(key, D, H, L)

    out = rnn_layers_forward(seq, seq_length, params, hidden_size=H)
    out = jax.block_until_ready(out)

    assert out.shape == (B, 1, H), out.shape

    ref = jax.block_until_ready(_reference_forward(seq, seq_length, params))
    assert jnp.allclose(out, ref, atol=1e-2, rtol=1e-2), \
        f"max abs diff {jnp.max(jnp.abs(out - ref))}"

    print("KERNEL_OK")
</pallas_src>

<mosaic_0001>
module attributes {stable_mosaic.version = 11 : i64} {
  func.func @kernel(%arg0: memref<32x16xf32, #tpu.memory_space<vmem>>, %arg1: memref<4x1xi32, #tpu.memory_space<vmem>>, %arg2: memref<16x32xf32, #tpu.memory_space<vmem>>, %arg3: memref<32x32xf32, #tpu.memory_space<vmem>>, %arg4: memref<1x32xf32, #tpu.memory_space<vmem>>, %arg5: memref<32x32xf32, #tpu.memory_space<vmem>>, %arg6: memref<32x32xf32, #tpu.memory_space<vmem>>, %arg7: memref<1x32xf32, #tpu.memory_space<vmem>>, %arg8: memref<4x32xf32, #tpu.memory_space<vmem>>, %arg9: memref<32x32xf32, #tpu.memory_space<vmem>>) attributes {dimension_semantics = [], scalar_prefetch = 0 : i64, scratch_operands = 1 : i64, tpu.core_type = #tpu.core_type<tc>} {
    %c0 = arith.constant 0 : index
    %c0_0 = arith.constant 0 : index
    %0 = vector.load %arg1[%c0, %c0_0] : memref<4x1xi32, #tpu.memory_space<vmem>>, vector<4x1xi32>
    %cst = arith.constant 0.000000e+00 : f32
    %1 = vector.broadcast %cst : f32 to vector<4x32xf32>
    %c0_1 = arith.constant 0 : index
    %c0_2 = arith.constant 0 : index
    %2 = vector.load %arg0[%c0_1, %c0_2] : memref<32x16xf32, #tpu.memory_space<vmem>>, vector<32x16xf32>
    %c0_3 = arith.constant 0 : index
    %c0_4 = arith.constant 0 : index
    %3 = vector.load %arg2[%c0_3, %c0_4] : memref<16x32xf32, #tpu.memory_space<vmem>>, vector<16x32xf32>
    %c0_5 = arith.constant 0 : index
    %c0_6 = arith.constant 0 : index
    %4 = vector.load %arg3[%c0_5, %c0_6] : memref<32x32xf32, #tpu.memory_space<vmem>>, vector<32x32xf32>
    %c0_7 = arith.constant 0 : index
    %c0_8 = arith.constant 0 : index
    %5 = vector.load %arg4[%c0_7, %c0_8] : memref<1x32xf32, #tpu.memory_space<vmem>>, vector<1x32xf32>
    %cst_9 = arith.constant dense<0.000000e+00> : vector<32x32xf32>
    %6 = tpu.matmul %2, %3, %cst_9 {dimension_numbers = #tpu.dot_dimension_numbers<[1], [0], [0], [1], [0, 0, 1, 1], [], []>} : vector<32x16xf32>, vector<16x32xf32>, vector<32x32xf32> -> vector<32x32xf32>
    %7 = vector.broadcast %5 : vector<1x32xf32> to vector<32x32xf32>
    %8 = arith.addf %6, %7 : vector<32x32xf32>
    %cst_10 = arith.constant 0.000000e+00 : f32
    %9 = vector.broadcast %cst_10 : f32 to vector<4x32xf32>
    %10 = vector.extract_strided_slice %8 {offsets = [0, 0], sizes = [4, 32], strides = [1, 1]} : vector<32x32xf32> to vector<4x32xf32>
    %cst_11 = arith.constant dense<0.000000e+00> : vector<4x32xf32>
    %11 = tpu.matmul %9, %4, %cst_11 {dimension_numbers = #tpu.dot_dimension_numbers<[1], [0], [0], [1], [0, 0, 1, 1], [], []>} : vector<4x32xf32>, vector<32x32xf32>, vector<4x32xf32> -> vector<4x32xf32>
    %12 = arith.addf %10, %11 : vector<4x32xf32>
    %13 = math.tanh %12 : vector<4x32xf32>
    %c0_12 = arith.constant 0 : index
    %c0_13 = arith.constant 0 : index
    %14 = vector.load %arg9[%c0_12, %c0_13] : memref<32x32xf32, #tpu.memory_space<vmem>>, vector<4x32xf32>
    tpu.vector_store %arg9[%c0_12, %c0_13], %13 {strides = array<i32>} : memref<32x32xf32, #tpu.memory_space<vmem>>, vector<4x32xf32>,
    %15 = vector.extract_strided_slice %8 {offsets = [4, 0], sizes = [4, 32], strides = [1, 1]} : vector<32x32xf32> to vector<4x32xf32>
    %cst_14 = arith.constant dense<0.000000e+00> : vector<4x32xf32>
    %16 = tpu.matmul %13, %4, %cst_14 {dimension_numbers = #tpu.dot_dimension_numbers<[1], [0], [0], [1], [0, 0, 1, 1], [], []>} : vector<4x32xf32>, vector<32x32xf32>, vector<4x32xf32> -> vector<4x32xf32>
    %17 = arith.addf %15, %16 : vector<4x32xf32>
    %18 = math.tanh %17 : vector<4x32xf32>
    %c4 = arith.constant 4 : index
    %c0_15 = arith.constant 0 : index
    %19 = vector.load %arg9[%c4, %c0_15] : memref<32x32xf32, #tpu.memory_space<vmem>>, vector<4x32xf32>
    tpu.vector_store %arg9[%c4, %c0_15], %18 {strides = array<i32>} : memref<32x32xf32, #tpu.memory_space<vmem>>, vector<4x32xf32>,
    %20 = vector.extract_strided_slice %8 {offsets = [8, 0], sizes = [4, 32], strides = [1, 1]} : vector<32x32xf32> to vector<4x32xf32>
    %cst_16 = arith.constant dense<0.000000e+00> : vector<4x32xf32>
    %21 = tpu.matmul %18, %4, %cst_16 {dimension_numbers = #tpu.dot_dimension_numbers<[1], [0], [0], [1], [0, 0, 1, 1], [], []>} : vector<4x32xf32>, vector<32x32xf32>, vector<4x32xf32> -> vector<4x32xf32>
    %22 = arith.addf %20, %21 : vector<4x32xf32>
    %23 = math.tanh %22 : vector<4x32xf32>
    %c8 = arith.constant 8 : index
    %c0_17 = arith.constant 0 : index
    %24 = vector.load %arg9[%c8, %c0_17] : memref<32x32xf32, #tpu.memory_space<vmem>>, vector<4x32xf32>
    tpu.vector_store %arg9[%c8, %c0_17], %23 {strides = array<i32>} : memref<32x32xf32, #tpu.memory_space<vmem>>, vector<4x32xf32>,
    %25 = vector.extract_strided_slice %8 {offsets = [12, 0], sizes = [4, 32], strides = [1, 1]} : vector<32x32xf32> to vector<4x32xf32>
    %cst_18 = arith.constant dense<0.000000e+00> : vector<4x32xf32>
    %26 = tpu.matmul %23, %4, %cst_18 {dimension_numbers = #tpu.dot_dimension_numbers<[1], [0], [0], [1], [0, 0, 1, 1], [], []>} : vector<4x32xf32>, vector<32x32xf32>, vector<4x32xf32> -> vector<4x32xf32>
    %27 = arith.addf %25, %26 : vector<4x32xf32>
    %28 = math.tanh %27 : vector<4x32xf32>
    %c12 = arith.constant 12 : index
    %c0_19 = arith.constant 0 : index
    %29 = vector.load %arg9[%c12, %c0_19] : memref<32x32xf32, #tpu.memory_space<vmem>>, vector<4x32xf32>
    tpu.vector_store %arg9[%c12, %c0_19], %28 {strides = array<i32>} : memref<32x32xf32, #tpu.memory_space<vmem>>, vector<4x32xf32>,
    %30 = vector.extract_strided_slice %8 {offsets = [16, 0], sizes = [4, 32], strides = [1, 1]} : vector<32x32xf32> to vector<4x32xf32>
    %cst_20 = arith.constant dense<0.000000e+00> : vector<4x32xf32>
    %31 = tpu.matmul %28, %4, %cst_20 {dimension_numbers = #tpu.dot_dimension_numbers<[1], [0], [0], [1], [0, 0, 1, 1], [], []>} : vector<4x32xf32>, vector<32x32xf32>, vector<4x32xf32> -> vector<4x32xf32>
    %32 = arith.addf %30, %31 : vector<4x32xf32>
    %33 = math.tanh %32 : vector<4x32xf32>
    %c16 = arith.constant 16 : index
    %c0_21 = arith.constant 0 : index
    %34 = vector.load %arg9[%c16, %c0_21] : memref<32x32xf32, #tpu.memory_space<vmem>>, vector<4x32xf32>
    tpu.vector_store %arg9[%c16, %c0_21], %33 {strides = array<i32>} : memref<32x32xf32, #tpu.memory_space<vmem>>, vector<4x32xf32>,
    %35 = vector.extract_strided_slice %8 {offsets = [20, 0], sizes = [4, 32], strides = [1, 1]} : vector<32x32xf32> to vector<4x32xf32>
    %cst_22 = arith.constant dense<0.000000e+00> : vector<4x32xf32>
    %36 = tpu.matmul %33, %4, %cst_22 {dimension_numbers = #tpu.dot_dimension_numbers<[1], [0], [0], [1], [0, 0, 1, 1], [], []>} : vector<4x32xf32>, vector<32x32xf32>, vector<4x32xf32> -> vector<4x32xf32>
    %37 = arith.addf %35, %36 : vector<4x32xf32>
    %38 = math.tanh %37 : vector<4x32xf32>
    %c20 = arith.constant 20 : index
    %c0_23 = arith.constant 0 : index
    %39 = vector.load %arg9[%c20, %c0_23] : memref<32x32xf32, #tpu.memory_space<vmem>>, vector<4x32xf32>
    tpu.vector_store %arg9[%c20, %c0_23], %38 {strides = array<i32>} : memref<32x32xf32, #tpu.memory_space<vmem>>, vector<4x32xf32>,
    %40 = vector.extract_strided_slice %8 {offsets = [24, 0], sizes = [4, 32], strides = [1, 1]} : vector<32x32xf32> to vector<4x32xf32>
    %cst_24 = arith.constant dense<0.000000e+00> : vector<4x32xf32>
    %41 = tpu.matmul %38, %4, %cst_24 {dimension_numbers = #tpu.dot_dimension_numbers<[1], [0], [0], [1], [0, 0, 1, 1], [], []>} : vector<4x32xf32>, vector<32x32xf32>, vector<4x32xf32> -> vector<4x32xf32>
    %42 = arith.addf %40, %41 : vector<4x32xf32>
    %43 = math.tanh %42 : vector<4x32xf32>
    %c24 = arith.constant 24 : index
    %c0_25 = arith.constant 0 : index
    %44 = vector.load %arg9[%c24, %c0_25] : memref<32x32xf32, #tpu.memory_space<vmem>>, vector<4x32xf32>
    tpu.vector_store %arg9[%c24, %c0_25], %43 {strides = array<i32>} : memref<32x32xf32, #tpu.memory_space<vmem>>, vector<4x32xf32>,
    %45 = vector.extract_strided_slice %8 {offsets = [28, 0], sizes = [4, 32], strides = [1, 1]} : vector<32x32xf32> to vector<4x32xf32>
    %cst_26 = arith.constant dense<0.000000e+00> : vector<4x32xf32>
    %46 = tpu.matmul %43, %4, %cst_26 {dimension_numbers = #tpu.dot_dimension_numbers<[1], [0], [0], [1], [0, 0, 1, 1], [], []>} : vector<4x32xf32>, vector<32x32xf32>, vector<4x32xf32> -> vector<4x32xf32>
    %47 = arith.addf %45, %46 : vector<4x32xf32>
    %48 = math.tanh %47 : vector<4x32xf32>
    %c28 = arith.constant 28 : index
    %c0_27 = arith.constant 0 : index
    %49 = vector.load %arg9[%c28, %c0_27] : memref<32x32xf32, #tpu.memory_space<vmem>>, vector<4x32xf32>
    tpu.vector_store %arg9[%c28, %c0_27], %48 {strides = array<i32>} : memref<32x32xf32, #tpu.memory_space<vmem>>, vector<4x32xf32>,
    %c0_28 = arith.constant 0 : index
    %c0_29 = arith.constant 0 : index
    %50 = vector.load %arg9[%c0_28, %c0_29] : memref<32x32xf32, #tpu.memory_space<vmem>>, vector<32x32xf32>
    %c0_30 = arith.constant 0 : index
    %c0_31 = arith.constant 0 : index
    %51 = vector.load %arg5[%c0_30, %c0_31] : memref<32x32xf32, #tpu.memory_space<vmem>>, vector<32x32xf32>
    %c0_32 = arith.constant 0 : index
    %c0_33 = arith.constant 0 : index
    %52 = vector.load %arg6[%c0_32, %c0_33] : memref<32x32xf32, #tpu.memory_space<vmem>>, vector<32x32xf32>
    %c0_34 = arith.constant 0 : index
    %c0_35 = arith.constant 0 : index
    %53 = vector.load %arg7[%c0_34, %c0_35] : memref<1x32xf32, #tpu.memory_space<vmem>>, vector<1x32xf32>
    %cst_36 = arith.constant dense<0.000000e+00> : vector<32x32xf32>
    %54 = tpu.matmul %50, %51, %cst_36 {dimension_numbers = #tpu.dot_dimension_numbers<[1], [0], [0], [1], [0, 0, 1, 1], [], []>} : vector<32x32xf32>, vector<32x32xf32>, vector<32x32xf32> -> vector<32x32xf32>
    %55 = vector.broadcast %53 : vector<1x32xf32> to vector<32x32xf32>
    %56 = arith.addf %54, %55 : vector<32x32xf32>
    %cst_37 = arith.constant 0.000000e+00 : f32
    %57 = vector.broadcast %cst_37 : f32 to vector<4x32xf32>
    %58 = vector.extract_strided_slice %56 {offsets = [0, 0], sizes = [4, 32], strides = [1, 1]} : vector<32x32xf32> to vector<4x32xf32>
    %cst_38 = arith.constant dense<0.000000e+00> : vector<4x32xf32>
    %59 = tpu.matmul %57, %52, %cst_38 {dimension_numbers = #tpu.dot_dimension_numbers<[1], [0], [0], [1], [0, 0, 1, 1], [], []>} : vector<4x32xf32>, vector<32x32xf32>, vector<4x32xf32> -> vector<4x32xf32>
    %60 = arith.addf %58, %59 : vector<4x32xf32>
    %61 = math.tanh %60 : vector<4x32xf32>
    %c0_i32 = arith.constant 0 : i32
    %62 = vector.broadcast %c0_i32 : i32 to vector<4x1xi32>
    %63 = arith.cmpi eq, %0, %62 : vector<4x1xi32>
    %64 = vector.shape_cast %63 : vector<4x1xi1> to vector<4x1xi1>
    %65 = vector.broadcast %64 : vector<4x1xi1> to vector<4x32xi1>
    %66 = arith.select %65, %61, %1 : vector<4x32xi1>, vector<4x32xf32>
    %67 = vector.extract_strided_slice %56 {offsets = [4, 0], sizes = [4, 32], strides = [1, 1]} : vector<32x32xf32> to vector<4x32xf32>
    %cst_39 = arith.constant dense<0.000000e+00> : vector<4x32xf32>
    %68 = tpu.matmul %61, %52, %cst_39 {dimension_numbers = #tpu.dot_dimension_numbers<[1], [0], [0], [1], [0, 0, 1, 1], [], []>} : vector<4x32xf32>, vector<32x32xf32>, vector<4x32xf32> -> vector<4x32xf32>
    %69 = arith.addf %67, %68 : vector<4x32xf32>
    %70 = math.tanh %69 : vector<4x32xf32>
    %c1_i32 = arith.constant 1 : i32
    %71 = vector.broadcast %c1_i32 : i32 to vector<4x1xi32>
    %72 = arith.cmpi eq, %0, %71 : vector<4x1xi32>
    %73 = vector.shape_cast %72 : vector<4x1xi1> to vector<4x1xi1>
    %74 = vector.broadcast %73 : vector<4x1xi1> to vector<4x32xi1>
    %75 = arith.select %74, %70, %66 : vector<4x32xi1>, vector<4x32xf32>
    %76 = vector.extract_strided_slice %56 {offsets = [8, 0], sizes = [4, 32], strides = [1, 1]} : vector<32x32xf32> to vector<4x32xf32>
    %cst_40 = arith.constant dense<0.000000e+00> : vector<4x32xf32>
    %77 = tpu.matmul %70, %52, %cst_40 {dimension_numbers = #tpu.dot_dimension_numbers<[1], [0], [0], [1], [0, 0, 1, 1], [], []>} : vector<4x32xf32>, vector<32x32xf32>, vector<4x32xf32> -> vector<4x32xf32>
    %78 = arith.addf %76, %77 : vector<4x32xf32>
    %79 = math.tanh %78 : vector<4x32xf32>
    %c2_i32 = arith.constant 2 : i32
    %80 = vector.broadcast %c2_i32 : i32 to vector<4x1xi32>
    %81 = arith.cmpi eq, %0, %80 : vector<4x1xi32>
    %82 = vector.shape_cast %81 : vector<4x1xi1> to vector<4x1xi1>
    %83 = vector.broadcast %82 : vector<4x1xi1> to vector<4x32xi1>
    %84 = arith.select %83, %79, %75 : vector<4x32xi1>, vector<4x32xf32>
    %85 = vector.extract_strided_slice %56 {offsets = [12, 0], sizes = [4, 32], strides = [1, 1]} : vector<32x32xf32> to vector<4x32xf32>
    %cst_41 = arith.constant dense<0.000000e+00> : vector<4x32xf32>
    %86 = tpu.matmul %79, %52, %cst_41 {dimension_numbers = #tpu.dot_dimension_numbers<[1], [0], [0], [1], [0, 0, 1, 1], [], []>} : vector<4x32xf32>, vector<32x32xf32>, vector<4x32xf32> -> vector<4x32xf32>
    %87 = arith.addf %85, %86 : vector<4x32xf32>
    %88 = math.tanh %87 : vector<4x32xf32>
    %c3_i32 = arith.constant 3 : i32
    %89 = vector.broadcast %c3_i32 : i32 to vector<4x1xi32>
    %90 = arith.cmpi eq, %0, %89 : vector<4x1xi32>
    %91 = vector.shape_cast %90 : vector<4x1xi1> to vector<4x1xi1>
    %92 = vector.broadcast %91 : vector<4x1xi1> to vector<4x32xi1>
    %93 = arith.select %92, %88, %84 : vector<4x32xi1>, vector<4x32xf32>
    %94 = vector.extract_strided_slice %56 {offsets = [16, 0], sizes = [4, 32], strides = [1, 1]} : vector<32x32xf32> to vector<4x32xf32>
    %cst_42 = arith.constant dense<0.000000e+00> : vector<4x32xf32>
    %95 = tpu.matmul %88, %52, %cst_42 {dimension_numbers = #tpu.dot_dimension_numbers<[1], [0], [0], [1], [0, 0, 1, 1], [], []>} : vector<4x32xf32>, vector<32x32xf32>, vector<4x32xf32> -> vector<4x32xf32>
    %96 = arith.addf %94, %95 : vector<4x32xf32>
    %97 = math.tanh %96 : vector<4x32xf32>
    %c4_i32 = arith.constant 4 : i32
    %98 = vector.broadcast %c4_i32 : i32 to vector<4x1xi32>
    %99 = arith.cmpi eq, %0, %98 : vector<4x1xi32>
    %100 = vector.shape_cast %99 : vector<4x1xi1> to vector<4x1xi1>
    %101 = vector.broadcast %100 : vector<4x1xi1> to vector<4x32xi1>
    %102 = arith.select %101, %97, %93 : vector<4x32xi1>, vector<4x32xf32>
    %103 = vector.extract_strided_slice %56 {offsets = [20, 0], sizes = [4, 32], strides = [1, 1]} : vector<32x32xf32> to vector<4x32xf32>
    %cst_43 = arith.constant dense<0.000000e+00> : vector<4x32xf32>
    %104 = tpu.matmul %97, %52, %cst_43 {dimension_numbers = #tpu.dot_dimension_numbers<[1], [0], [0], [1], [0, 0, 1, 1], [], []>} : vector<4x32xf32>, vector<32x32xf32>, vector<4x32xf32> -> vector<4x32xf32>
    %105 = arith.addf %103, %104 : vector<4x32xf32>
    %106 = math.tanh %105 : vector<4x32xf32>
    %c5_i32 = arith.constant 5 : i32
    %107 = vector.broadcast %c5_i32 : i32 to vector<4x1xi32>
    %108 = arith.cmpi eq, %0, %107 : vector<4x1xi32>
    %109 = vector.shape_cast %108 : vector<4x1xi1> to vector<4x1xi1>
    %110 = vector.broadcast %109 : vector<4x1xi1> to vector<4x32xi1>
    %111 = arith.select %110, %106, %102 : vector<4x32xi1>, vector<4x32xf32>
    %112 = vector.extract_strided_slice %56 {offsets = [24, 0], sizes = [4, 32], strides = [1, 1]} : vector<32x32xf32> to vector<4x32xf32>
    %cst_44 = arith.constant dense<0.000000e+00> : vector<4x32xf32>
    %113 = tpu.matmul %106, %52, %cst_44 {dimension_numbers = #tpu.dot_dimension_numbers<[1], [0], [0], [1], [0, 0, 1, 1], [], []>} : vector<4x32xf32>, vector<32x32xf32>, vector<4x32xf32> -> vector<4x32xf32>
    %114 = arith.addf %112, %113 : vector<4x32xf32>
    %115 = math.tanh %114 : vector<4x32xf32>
    %c6_i32 = arith.constant 6 : i32
    %116 = vector.broadcast %c6_i32 : i32 to vector<4x1xi32>
    %117 = arith.cmpi eq, %0, %116 : vector<4x1xi32>
    %118 = vector.shape_cast %117 : vector<4x1xi1> to vector<4x1xi1>
    %119 = vector.broadcast %118 : vector<4x1xi1> to vector<4x32xi1>
    %120 = arith.select %119, %115, %111 : vector<4x32xi1>, vector<4x32xf32>
    %121 = vector.extract_strided_slice %56 {offsets = [28, 0], sizes = [4, 32], strides = [1, 1]} : vector<32x32xf32> to vector<4x32xf32>
    %cst_45 = arith.constant dense<0.000000e+00> : vector<4x32xf32>
    %122 = tpu.matmul %115, %52, %cst_45 {dimension_numbers = #tpu.dot_dimension_numbers<[1], [0], [0], [1], [0, 0, 1, 1], [], []>} : vector<4x32xf32>, vector<32x32xf32>, vector<4x32xf32> -> vector<4x32xf32>
    %123 = arith.addf %121, %122 : vector<4x32xf32>
    %124 = math.tanh %123 : vector<4x32xf32>
    %c7_i32 = arith.constant 7 : i32
    %125 = vector.broadcast %c7_i32 : i32 to vector<4x1xi32>
    %126 = arith.cmpi eq, %0, %125 : vector<4x1xi32>
    %127 = vector.shape_cast %126 : vector<4x1xi1> to vector<4x1xi1>
    %128 = vector.broadcast %127 : vector<4x1xi1> to vector<4x32xi1>
    %129 = arith.select %128, %124, %120 : vector<4x32xi1>, vector<4x32xf32>
    %c0_46 = arith.constant 0 : index
    %c0_47 = arith.constant 0 : index
    %130 = vector.load %arg8[%c0_46, %c0_47] : memref<4x32xf32, #tpu.memory_space<vmem>>, vector<4x32xf32>
    tpu.vector_store %arg8[%c0_46, %c0_47], %129 {strides = array<i32>} : memref<4x32xf32, #tpu.memory_space<vmem>>, vector<4x32xf32>,
    return
  }
}

</mosaic_0001>

<bundles_post_ra>
// kernel: rnn_layers_forward.1
= control target key start
LH: loop header
LB: loop body
LE: loop exit
PB: predicated region body
PF: predicated region fallthrough
CT: control target
= control target key end

     0   :  { %vm45_vm0 = vcmask 130048   ;;  %s959_s0 = inlined_call_operand.vmem [shape: f32[32,16], index: 0, kind: input, shape index: {}]   ;;  %s960_s1 = inlined_call_operand.vmem [shape: s32[4,1], index: 1, kind: input, shape index: {}]   ;;  %s961_s2 = inlined_call_operand.vmem [shape: f32[16,32], index: 2, kind: input, shape index: {}]   ;;  %s962_s3 = inlined_call_operand.vmem [shape: f32[32,32], index: 3, kind: input, shape index: {}]   ;;  %s963_s4 = inlined_call_operand.vmem [shape: f32[1,32], index: 4, kind: input, shape index: {}]   ;;  %s964_s5 = inlined_call_operand.vmem [shape: f32[32,32], index: 5, kind: input, shape index: {}]   ;;  %s965_s6 = inlined_call_operand.vmem [shape: f32[32,32], index: 6, kind: input, shape index: {}]   ;;  %s966_s7 = inlined_call_operand.vmem [shape: f32[1,32], index: 7, kind: input, shape index: {}]   ;;  %s967_s8 = inlined_call_operand.hbm [shape: f32[4,32], index: 8, kind: output, shape index: {}]  }
   0x1   :  { %v40_v0 = vld [vmem:[%s962_s3 + $0x18] sm:$0xff]  ;;  %v36_v1 = vld [vmem:[%s961_s2 + $0x8] sm:$0xff]  ;;  %v39_v2 = vld [vmem:[%s962_s3 + $0x10] sm:$0xff] }
   0x2   :  { %103 = vmatpush.msra.mxu1 %v40_v0  ;;  %72 = vmatpush.msra.mxu0 %v36_v1  ;;  %v35_v3 = vld [vmem:[%s961_s2] sm:$0xff]  ;;  %v38_v5 = vld [vmem:[%s962_s3 + $0x8] sm:$0xff] }
   0x3   :  { %v31_v4 = vld [vmem:[%s959_s0] sm:$0xff]  ;;  %130 = vmatpush.msra.mxu2 %v40_v0  ;;  %161 = vmatpush.msra.mxu3 %v40_v0 }
   0x4   :  { %104 = vmatpush.msra.mxu1 %v39_v2  ;;  %73 = vmatpush.msra.mxu0 %v35_v3 }
   0x5   :  { %13 = vsyncpa [#allocation4], 0  ;;  %661 = vmatmul.msk.f32.vlgmr.msra.gmra.mxu0 %vm45_vm0, %v31_v4  ;;  %v37_v6 = vld [vmem:[%s962_s3] sm:$0xff]  ;;  %131 = vmatpush.msra.mxu2 %v39_v2  ;;  %v749_v7 = vmov 0.0   ;;  %vm113_vm1 = vcmask 257024   ;;  %vm87_vm2 = vcmask 261120  }
   0x6   :  { %105 = vmatpush.msra.mxu1 %v38_v5  ;;  %162 = vmatpush.msra.mxu3 %v39_v2  ;;  %v823_v8 = vld [vmem:[%s963_s4] ss:$0 sm:$0xff]  ;;  %v32_v14 = vld [vmem:[%s959_s0 + $0x8] sm:$0xff]  ;;  %vm143_vm3 = vcmask 261124   ;;  %v33_v25 = vld [vmem:[%s959_s0 + $0x10] sm:$0xff]  ;;  %v750_v48 = vmov 0  }
   0x7   :  { %132 = vmatpush.msra.mxu2 %v38_v5  ;;  %v320_v31 = vld [vmem:[%s964_s5 + $0x18] sm:$0xff]  ;;  %v319_v32 = vld [vmem:[%s964_s5 + $0x10] sm:$0xff]  ;;  %v318_v33 = vld [vmem:[%s964_s5 + $0x8] sm:$0xff]  ;;  %686 = vset.pattern.permute.xlu0 %v750_v48  ;;  %s652_s19 = sshll.u32 %s967_s8, 4  ;;  %s653_s19 = int_to_ptr.hbm [resolvable:$true] %s652_s19 }
   0x8   :  { %106 = vmatpush.msra.mxu1 %v37_v6  ;;  %163 = vmatpush.msra.mxu3 %v38_v5  ;;  %v317_v34 = vld [vmem:[%s964_s5] sm:$0xff]  ;;  %v34_v42 = vld [vmem:[%s959_s0 + $0x18] sm:$0xff]  ;;  %v874_v44 = vld [vmem:[%s965_s6 + $0x10] sm:$0xff] }
   0x9   :  { %107 = vmatmul.f32.vlgmr.msra.gmra.mxu1 %v749_v7  ;;  %133 = vmatpush.msra.mxu2 %v37_v6  ;;  %v867_v43 = vld [vmem:[%s965_s6 + $0x18] sm:$0xff]  ;;  %v881_v45 = vld [vmem:[%s965_s6 + $0x8] sm:$0xff]  ;;  %v321_v46 = vld [vmem:[%s965_s6] sm:$0xff] }
   0xa   :  { %164 = vmatpush.msra.mxu3 %v37_v6  ;;  %187 = vmatpush.msrb.mxu1 %v40_v0  ;;  %v894_v47 = vld [vmem:[%s960_s1] sm:$0xf] }
   0xb   :  { %217 = vmatpush.msrb.mxu2 %v40_v0  ;;  %451 = vmatpush.msrb.mxu0 %v867_v43  ;;  %vm392_vm4 = vcmp.eq.s32.totalorder %v894_v47, 0  ;;  %vm427_vm5 = vcmp.eq.s32.totalorder %v894_v47, 1  ;;  %v920_v61 = vld [vmem:[%s966_s7] ss:$0 sm:$0xff]  ;;  %vm461_vm6 = vcmp.eq.s32.totalorder %v894_v47, 2  ;;  %vm496_vm9 = vcmp.eq.s32.totalorder %v894_v47, 3 }
   0xc   :  { %243 = vmatpush.msrb.mxu3 %v40_v0  ;;  %188 = vmatpush.msrb.mxu1 %v39_v2  ;;  %v393_v49 = vsel %vm392_vm4, 1, %v750_v48  ;;  %v428_v56 = vsel %vm427_vm5, 1, %v750_v48  ;;  %v462_v4 = vsel %vm461_vm6, 1, %v750_v48  ;;  %vm530_vm11 = vcmp.eq.s32.totalorder %v894_v47, 4  ;;  %s751_s7 = smov [#allocation3]  }
   0xd   :  { %218 = vmatpush.msrb.mxu2 %v39_v2  ;;  %662 = vmatmul.msk.f32.gmra.mxu0 %vm45_vm0, %v32_v14  ;;  %vm565_vm13 = vcmp.eq.s32.totalorder %v894_v47, 5  ;;  %vm599_vm15 = vcmp.eq.s32.totalorder %v894_v47, 6  ;;  %s650_s18 = sshll.u32 %s751_s7, 4  ;;  %s651_s18 = int_to_ptr.vmem [resolvable:$true] %s650_s18 }
   0xe   :  { %244 = vmatpush.msrb.mxu3 %v39_v2  ;;  %189 = vmatpush.msrb.mxu1 %v38_v5 }
   0xf   :  { %219 = vmatpush.msrb.mxu2 %v38_v5  ;;  %452 = vmatpush.msrb.mxu0 %v874_v44 }
  0x10   :  { %245 = vmatpush.msrb.mxu3 %v38_v5  ;;  %190 = vmatpush.msrb.mxu1 %v37_v6 }
  0x11   :  { %220 = vmatpush.msrb.mxu2 %v37_v6  ;;  %453 = vmatpush.msrb.mxu0 %v881_v45 }
  0x12   :  { %246 = vmatpush.msrb.mxu3 %v37_v6  ;;  %273 = vmatpush.msra.mxu1 %v40_v0 }
  0x13   :  { %454 = vmatpush.msrb.mxu0 %v321_v46  ;;  %687 = vset.pattern.permute.xlu1 %v750_v48 }
  0x14   :  { %274 = vmatpush.msra.mxu1 %v39_v2  ;;  %688 = vset.pattern.permute.xlu2 %v750_v48 }
  0x15   :  { %663 = vmatmul.msk.f32.gmra.mxu0 %vm45_vm0, %v33_v25  ;;  %395 = vperm.xlu0 %686, %v393_v49  }
  0x16   :  { %275 = vmatpush.msra.mxu1 %v38_v5  ;;  %552 = vmatpush.msra.mxu0 %v867_v43 }
  0x17   :  { %464 = vperm.xlu1 %687, %v462_v4  }
  0x18   :  { %276 = vmatpush.msra.mxu1 %v37_v6  ;;  %553 = vmatpush.msra.mxu0 %v874_v44 }
  0x1a   :  { %554 = vmatpush.msra.mxu0 %v881_v45 }
  0x1c   :  { %555 = vmatpush.msra.mxu0 %v321_v46 }
  0x1d   :  { %664 = vmatmul.msk.f32.gmra.mxu0 %vm45_vm0, %v34_v42  ;;  %430 = vperm.xlu0 %686, %v428_v56  }
  0x82   :  { %v75_v9 = vpop.f32.mrf.mxu0 }
  0x83   :  { %v76_v10 = vadd.f32 %v823_v8, %v75_v9 }
  0x86   :  { %v108_v11 = vpop.f32.mrf.mxu1 }
  0x87   :  { %v111_v12 = vadd.f32 %v108_v11, %v76_v10 }
  0x89   :  { %691 = vtanh.f32 %v111_v12 }
  0x8a   :  { %v78_v20 = vpop.f32.mrf.mxu0 }
  0x8b   :  { %v79_v21 = vadd.f32 %v823_v8, %v78_v20 }
  0x8f   :  { %v692_v13 = vpop.eup %691 }
  0x90   :  { %114 = vst.msk [vmem:[#allocation2] sm:$0xf] %vm113_vm1, %v692_v13  ;;  %665 = vmatmul.msk.f32.vlgmr.msra.gmra.mxu2 %vm87_vm2, %v692_v13 }
  0x91   :  { %299 = vmatpush.msra.mxu2 %v40_v0 }
  0x92   :  { %v81_v35 = vpop.f32.mrf.mxu0 }
  0x93   :  { %300 = vmatpush.msra.mxu2 %v39_v2  ;;  %v82_v36 = vadd.f32 %v823_v8, %v81_v35  ;;  %v566_v35 = vsel %vm565_vm13, 1, %v750_v48 }
  0x95   :  { %301 = vmatpush.msra.mxu2 %v38_v5 }
  0x97   :  { %302 = vmatpush.msra.mxu2 %v37_v6 }
  0x9a   :  { %v84_v57 = vpop.f32.mrf.mxu0 }
  0x9b   :  { %v85_v58 = vadd.f32 %v823_v8, %v84_v57  ;;  %v396_v8 = vpop.permute.xlu0 %395 }
  0x9c   :  { %vm397_vm7 = vcmp.eq.s32.totalorder %v396_v8, 1 }
  0xa3   :  { %v431_v13 = vpop.permute.xlu0 %430 }
  0xa4   :  { %vm432_vm8 = vcmp.eq.s32.totalorder %v431_v13, 1 }
 0x113   :  { %v135_v15 = vpop.f32.mrf.mxu2 }
 0x114   :  { %v139_v16 = vrot.slane %v135_v15, 4 }
 0x116   :  { %v141_v17 = vadd.f32 %v139_v16, %v76_v10 }
 0x118   :  { %693 = vtanh.f32 %v141_v17 }
 0x11e   :  { %v694_v18 = vpop.eup %693 }
 0x11f   :  { %144 = vst.msk [vmem:[#allocation2] sm:$0xf0] %vm143_vm3, %v694_v18  ;;  %v146_v19 = vrot.slane %v694_v18, 4 }
 0x121   :  { %666 = vmatmul.msk.f32.vlgmr.msra.gmra.mxu3 %vm87_vm2, %v146_v19  ;;  %v497_v19 = vsel %vm496_vm9, 1, %v750_v48 }
 0x122   :  { %353 = vmatpush.msra.mxu3 %v320_v31  ;;  %499 = vperm.xlu1 %687, %v497_v19  }
 0x124   :  { %354 = vmatpush.msra.mxu3 %v319_v32 }
 0x126   :  { %355 = vmatpush.msra.mxu3 %v318_v33  ;;  %v313_v40 = vld [vmem:[#allocation2] sm:$0xff] }
 0x128   :  { %356 = vmatpush.msra.mxu3 %v317_v34 }
 0x1a4   :  { %v166_v22 = vpop.f32.mrf.mxu3 }
 0x1a5   :  { %v169_v23 = vadd.f32 %v166_v22, %v79_v21 }
 0x1a7   :  { %695 = vtanh.f32 %v169_v23 }
 0x1ad   :  { %v696_v24 = vpop.eup %695 }
 0x1ae   :  { %171 = vst.msk [vmem:[#allocation2 + $0x8] sm:$0xf] %vm113_vm1, %v696_v24  ;;  %667 = vmatmul.msk.f32.vlgmr.msrb.gmra.mxu1 %vm87_vm2, %v696_v24  ;;  %v465_v24 = vpop.permute.xlu1 %464 }
 0x1af   :  { %382 = vmatpush.msrb.mxu1 %v867_v43  ;;  %vm466_vm10 = vcmp.eq.s32.totalorder %v465_v24, 1 }
 0x1b1   :  { %383 = vmatpush.msrb.mxu1 %v874_v44 }
 0x1b3   :  { %384 = vmatpush.msrb.mxu1 %v881_v45 }
 0x1b5   :  { %385 = vmatpush.msrb.mxu1 %v321_v46 }
 0x1b6   :  { %v500_v31 = vpop.permute.xlu1 %499 }
 0x1b7   :  { %vm501_vm12 = vcmp.eq.s32.totalorder %v500_v31, 1 }
 0x22b   :  { %v192_v26 = vpop.f32.mrf.mxu1 }
 0x22c   :  { %v196_v27 = vrot.slane %v192_v26, 4 }
 0x22e   :  { %v198_v28 = vadd.f32 %v196_v27, %v79_v21  ;;  %v531_v27 = vsel %vm530_vm11, 1, %v750_v48 }
 0x22f   :  { %533 = vperm.xlu2 %688, %v531_v27  }
 0x230   :  { %697 = vtanh.f32 %v198_v28 }
 0x236   :  { %v698_v29 = vpop.eup %697 }
 0x237   :  { %200 = vst.msk [vmem:[#allocation2 + $0x8] sm:$0xf0] %vm143_vm3, %v698_v29  ;;  %v202_v30 = vrot.slane %v698_v29, 4  ;;  %568 = vperm.xlu2 %688, %v566_v35  }
 0x239   :  { %668 = vmatmul.msk.f32.vlgmr.msrb.gmra.mxu2 %vm87_vm2, %v202_v30 }
 0x23a   :  { %414 = vmatpush.msrb.mxu2 %v867_v43 }
 0x23c   :  { %415 = vmatpush.msrb.mxu2 %v874_v44 }
 0x23e   :  { %v314_v41 = vld [vmem:[#allocation2 + $0x8] sm:$0xff]  ;;  %416 = vmatpush.msrb.mxu2 %v881_v45 }
 0x240   :  { %417 = vmatpush.msrb.mxu2 %v321_v46 }
 0x2bc   :  { %v222_v37 = vpop.f32.mrf.mxu2 }
 0x2bd   :  { %v225_v38 = vadd.f32 %v222_v37, %v82_v36 }
 0x2bf   :  { %699 = vtanh.f32 %v225_v38 }
 0x2c5   :  { %v700_v39 = vpop.eup %699 }
 0x2c6   :  { %227 = vst.msk [vmem:[#allocation2 + $0x10] sm:$0xf] %vm113_vm1, %v700_v39  ;;  %669 = vmatmul.msk.f32.vlgmr.msrb.gmra.mxu3 %vm87_vm2, %v700_v39 }
 0x2ce   :  { %672 = vmatmul.msk.f32.vlgmr.msra.gmra.mxu3 %vm87_vm2, %v313_v40  ;;  %v534_v40 = vpop.permute.xlu2 %533 }
 0x2cf   :  { %vm535_vm14 = vcmp.eq.s32.totalorder %v534_v40, 1 }
 0x2d6   :  { %673 = vmatmul.msk.f32.gmra.mxu3 %vm87_vm2, %v314_v41  ;;  %v569_v49 = vpop.permute.xlu2 %568 }
 0x2d7   :  { %vm570_vm0 = vcmp.eq.s32.totalorder %v569_v49, 1 }
 0x349   :  { %v248_v50 = vpop.f32.mrf.mxu3 }
 0x34a   :  { %v252_v51 = vrot.slane %v248_v50, 4 }
 0x34c   :  { %v254_v52 = vadd.f32 %v252_v51, %v82_v36 }
 0x34e   :  { %701 = vtanh.f32 %v254_v52 }
 0x351   :  { %v358_v62 = vpop.f32.mrf.mxu3 }
 0x352   :  { %v359_v63 = vadd.f32 %v920_v61, %v358_v62 }
 0x354   :  { %v702_v53 = vpop.eup %701 }
 0x355   :  { %256 = vst.msk [vmem:[#allocation2 + $0x10] sm:$0xf0] %vm143_vm3, %v702_v53  ;;  %v258_v54 = vrot.slane %v702_v53, 4 }
 0x357   :  { %670 = vmatmul.msk.f32.vlgmr.msra.gmra.mxu1 %vm87_vm2, %v258_v54 }
 0x358   :  { %483 = vmatpush.msra.mxu1 %v867_v43 }
 0x359   :  { %v361_v20 = vpop.f32.mrf.mxu3 }
 0x35a   :  { %484 = vmatpush.msra.mxu1 %v874_v44  ;;  %v362_v21 = vadd.f32 %v920_v61, %v361_v20 }
 0x35c   :  { %v315_v55 = vld [vmem:[#allocation2 + $0x10] sm:$0xff]  ;;  %485 = vmatpush.msra.mxu1 %v881_v45 }
 0x35d   :  { %674 = vmatmul.msk.f32.gmra.mxu3 %vm87_vm2, %v315_v55 }
 0x35e   :  { %486 = vmatpush.msra.mxu1 %v321_v46 }
 0x35f   :  { %386 = vmatmul.f32.vlgmr.msrb.gmra.mxu1 %v749_v7 }
 0x360   :  { %589 = vmatpush.msrb.mxu1 %v867_v43 }
 0x362   :  { %590 = vmatpush.msrb.mxu1 %v874_v44 }
 0x364   :  { %591 = vmatpush.msrb.mxu1 %v881_v45 }
 0x366   :  { %592 = vmatpush.msrb.mxu1 %v321_v46 }
 0x3d4   :  { %v278_v59 = vpop.f32.mrf.mxu1 }
 0x3d5   :  { %v281_v60 = vadd.f32 %v278_v59, %v85_v58 }
 0x3d7   :  { %703 = vtanh.f32 %v281_v60 }
 0x3dc   :  { %v387_v0 = vpop.f32.mrf.mxu1 }
 0x3dd   :  { %v704_v1 = vpop.eup %703  ;;  %v390_v2 = vadd.f32 %v387_v0, %v359_v63 }
 0x3de   :  { %283 = vst.msk [vmem:[#allocation2 + $0x18] sm:$0xf] %vm113_vm1, %v704_v1  ;;  %671 = vmatmul.msk.f32.vlgmr.msra.gmra.mxu2 %vm87_vm2, %v704_v1 }
 0x3df   :  { %705 = vtanh.f32 %v390_v2  ;;  %520 = vmatpush.msra.mxu2 %v867_v43 }
 0x3e0   :  { %v364_v36 = vpop.f32.mrf.mxu3 }
 0x3e1   :  { %521 = vmatpush.msra.mxu2 %v874_v44  ;;  %v365_v37 = vadd.f32 %v920_v61, %v364_v36 }
 0x3e3   :  { %522 = vmatpush.msra.mxu2 %v881_v45 }
 0x3e5   :  { %v706_v3 = vpop.eup %705  ;;  %523 = vmatpush.msra.mxu2 %v321_v46 }
 0x3e6   :  { %676 = vmatmul.msk.f32.vlgmr.msrb.gmra.mxu2 %vm87_vm2, %v706_v3  ;;  %v398_v17 = vsel %vm397_vm7, %v706_v3, 0.0 }
 0x3e7   :  { %621 = vmatpush.msrb.mxu2 %v867_v43  ;;  %v600_v43 = vsel %vm599_vm15, 1, %v750_v48 }
 0x3e8   :  { %602 = vperm.xlu0 %686, %v600_v43  }
 0x3e9   :  { %622 = vmatpush.msrb.mxu2 %v874_v44 }
 0x3eb   :  { %623 = vmatpush.msrb.mxu2 %v881_v45 }
 0x3ed   :  { %624 = vmatpush.msrb.mxu2 %v321_v46 }
 0x461   :  { %v304_v5 = vpop.f32.mrf.mxu2 }
 0x462   :  { %v308_v6 = vrot.slane %v304_v5, 4 }
 0x464   :  { %v310_v7 = vadd.f32 %v308_v6, %v85_v58  ;;  %v603_v58 = vpop.permute.xlu0 %602 }
 0x465   :  { %vm604_vm4 = vcmp.eq.s32.totalorder %v603_v58, 1 }
 0x466   :  { %707 = vtanh.f32 %v310_v7 }
 0x469   :  { %v419_v9 = vpop.f32.mrf.mxu2 }
 0x46a   :  { %v423_v10 = vrot.slane %v419_v9, 4 }
 0x46c   :  { %v708_v11 = vpop.eup %707  ;;  %v425_v12 = vadd.f32 %v423_v10, %v359_v63 }
 0x46d   :  { %312 = vst.msk [vmem:[#allocation2 + $0x18] sm:$0xf0] %vm143_vm3, %v708_v11  ;;  %vm634_vm3 = vcmp.eq.s32.totalorder %v894_v47, 7 }
 0x46e   :  { %709 = vtanh.f32 %v425_v12  ;;  %v635_v53 = vsel %vm634_vm3, 1, %v750_v48 }
 0x46f   :  { %637 = vperm.xlu1 %687, %v635_v53  }
 0x474   :  { %v710_v14 = vpop.eup %709  ;;  %v316_v15 = vld [vmem:[#allocation2 + $0x18] sm:$0xff] }
 0x475   :  { %v434_v16 = vrot.slane %v710_v14, 4  ;;  %675 = vmatmul.msk.f32.gmra.mxu3 %vm87_vm2, %v316_v15 }
 0x477   :  { %v436_v18 = vsel %vm432_vm8, %v434_v16, %v398_v17  ;;  %677 = vmatmul.msk.f32.vlgmr.msrb.gmra.mxu0 %vm87_vm2, %v434_v16 }
 0x4e1   :  { %v638_v47 = vpop.permute.xlu1 %637 }
 0x4e2   :  { %vm639_vm5 = vcmp.eq.s32.totalorder %v638_v47, 1 }
 0x4f4   :  { %v456_v22 = vpop.f32.mrf.mxu0 }
 0x4f5   :  { %v459_v23 = vadd.f32 %v456_v22, %v362_v21 }
 0x4f7   :  { %711 = vtanh.f32 %v459_v23 }
 0x4f8   :  { %v367_v54 = vpop.f32.mrf.mxu3 }
 0x4f9   :  { %v368_v55 = vadd.f32 %v920_v61, %v367_v54 }
 0x4fd   :  { %v712_v25 = vpop.eup %711 }
 0x4fe   :  { %v467_v26 = vsel %vm466_vm10, %v712_v25, %v436_v18  ;;  %678 = vmatmul.msk.f32.vlgmr.msra.gmra.mxu1 %vm87_vm2, %v712_v25 }
 0x57b   :  { %v488_v28 = vpop.f32.mrf.mxu1 }
 0x57c   :  { %v492_v29 = vrot.slane %v488_v28, 4 }
 0x57e   :  { %v494_v30 = vadd.f32 %v492_v29, %v362_v21 }
 0x580   :  { %713 = vtanh.f32 %v494_v30 }
 0x586   :  { %v714_v32 = vpop.eup %713 }
 0x587   :  { %v503_v33 = vrot.slane %v714_v32, 4 }
 0x589   :  { %v505_v34 = vsel %vm501_vm12, %v503_v33, %v467_v26  ;;  %679 = vmatmul.msk.f32.vlgmr.msra.gmra.mxu2 %vm87_vm2, %v503_v33 }
 0x60c   :  { %v525_v38 = vpop.f32.mrf.mxu2 }
 0x60d   :  { %v528_v39 = vadd.f32 %v525_v38, %v365_v37 }
 0x60f   :  { %715 = vtanh.f32 %v528_v39 }
 0x615   :  { %v716_v41 = vpop.eup %715 }
 0x616   :  { %v536_v42 = vsel %vm535_vm14, %v716_v41, %v505_v34  ;;  %680 = vmatmul.msk.f32.vlgmr.msra.gmra.mxu0 %vm87_vm2, %v716_v41 }
 0x693   :  { %v557_v44 = vpop.f32.mrf.mxu0 }
 0x694   :  { %v561_v45 = vrot.slane %v557_v44, 4 }
 0x696   :  { %v563_v46 = vadd.f32 %v561_v45, %v365_v37 }
 0x698   :  { %717 = vtanh.f32 %v563_v46 }
 0x69e   :  { %v718_v50 = vpop.eup %717 }
 0x69f   :  { %v572_v51 = vrot.slane %v718_v50, 4 }
 0x6a1   :  { %v574_v52 = vsel %vm570_vm0, %v572_v51, %v536_v42  ;;  %681 = vmatmul.msk.f32.vlgmr.msrb.gmra.mxu1 %vm87_vm2, %v572_v51 }
 0x71e   :  { %v594_v56 = vpop.f32.mrf.mxu1 }
 0x71f   :  { %v597_v57 = vadd.f32 %v594_v56, %v368_v55 }
 0x721   :  { %719 = vtanh.f32 %v597_v57 }
 0x727   :  { %v720_v59 = vpop.eup %719 }
 0x728   :  { %v605_v60 = vsel %vm604_vm4, %v720_v59, %v574_v52  ;;  %682 = vmatmul.msk.f32.vlgmr.msrb.gmra.mxu2 %vm87_vm2, %v720_v59 }
 0x7ab   :  { %v626_v62 = vpop.f32.mrf.mxu2 }
 0x7ac   :  { %v630_v63 = vrot.slane %v626_v62, 4 }
 0x7ae   :  { %v632_v0 = vadd.f32 %v630_v63, %v368_v55 }
 0x7b0   :  { %721 = vtanh.f32 %v632_v0 }
 0x7b6   :  { %v722_v48 = vpop.eup %721 }
 0x7b7   :  { %v641_v61 = vrot.slane %v722_v48, 4 }
 0x7b9   :  { %v643_v1 = vsel %vm639_vm5, %v641_v61, %v605_v60 }
 0x7ba   :  { %644 = vst.msk [vmem:[#allocation3] sm:$0xf] %vm113_vm1, %v643_v1 }
 0x7bb   :  { %655 = dma.vmem_to_hbm [thread:$0]  %s651_s18, 64, %s653_s19, [#allocation4]  }
 0x7bc   :  { %747 = dma.done.wait [#allocation4], 64  }
 0x7bd   :  { %748 = vsyncadd [#allocation4], 4294967232 }
 0x7be   :  { %660 = vsyncpa [#allocation4], 1 }

</bundles_post_ra>
